<compile_context>
chip_gen: v5e
topology: v5e:2x2
jax: 0.10.0
libtpu: 0.0.40
codegen_flags: <defaults>
</compile_context>

<pallas_src>
import math

import jax
import jax.numpy as jnp
from jax import lax
from jax.experimental import pallas as pl
from jax.experimental.pallas import tpu as pltpu

BN_EPS = 1e-5
LANE = 128


def _vmem_capacity_bytes():
    """Physical VMEM of the current TPU generation (fallback: v7x per-TC 64MiB)."""
    try:
        return int(pltpu.get_tpu_info().vmem_capacity_bytes)
    except Exception:
        return 64 * 1024 * 1024


def _largest_divisor_tile(bs, per_b_bytes, budget_bytes):
    """Largest divisor of bs whose per-tile working set fits the budget."""
    tb = max(1, min(bs, budget_bytes // max(per_b_bytes, 1)))
    while bs % tb:
        tb -= 1
    return int(tb)


def gconv(W, x, conv_w, conv_b, gamma, beta, *, tile_b=None, tile_b_norm=None):
    """Gconv forward.  W: (bs,n,n), x: (bs,n,c), conv_w: (c,2c), rest: (c,)."""
    bs, n, c = x.shape
    assert W.shape == (bs, n, n)
    assert conv_w.shape == (c, 2 * c)

    # Train-mode BatchNorm subtracts the batch mean, which cancels any
    # per-channel constant -> the conv bias never reaches the kernel.
    # TODO(synk): BatchNorm2d running_mean/running_var buffer updates (training
    # side effect) are not produced by this functional forward.
    del conv_b

    in_dtype = x.dtype
    mm_dtype = jnp.bfloat16 if in_dtype == jnp.bfloat16 else jnp.float32
    spill_dtype = in_dtype if in_dtype == jnp.bfloat16 else jnp.float32

    # ---- pad channel dim to a 128-lane multiple (lane-dense slices & stores) --
    c_pad = ((c + LANE - 1) // LANE) * LANE
    pad = c_pad - c
    x_p = jnp.pad(x, ((0, 0), (0, 0), (0, pad))) if pad else x
    # Stack the two halves of the 1x1-conv weight -> one 2*c_pad-wide MXU matmul.
    wx = conv_w[:, :c].T                         # (c, c): x @ wx
    wn = conv_w[:, c:].T                         # (c, c): x @ wn, then bmm by W
    if pad:
        wx = jnp.pad(wx, ((0, pad), (0, pad)))
        wn = jnp.pad(wn, ((0, pad), (0, pad)))
    wcat = jnp.concatenate([wx, wn], axis=1).astype(in_dtype)   # (c_pad, 2*c_pad)
    g2 = jnp.pad(gamma.astype(jnp.float32), (0, pad)).reshape(1, c_pad)
    b2 = jnp.pad(beta.astype(jnp.float32), (0, pad)).reshape(1, c_pad)

    # ---- generation-aware VMEM limit and tile sizes --------------------------
    vmem_cap = _vmem_capacity_bytes()
    vmem_limit = int(vmem_cap * 3 // 4)          # ~96 MiB v5e/v6e, ~48 MiB v7x
    budget = vmem_limit // 2                      # leave half for pipelining slack
    itm = jnp.dtype(in_dtype).itemsize
    spill_itm = jnp.dtype(spill_dtype).itemsize
    w_itm = jnp.dtype(W.dtype).itemsize
    fixed = 2 * wcat.size * itm + 8 * c_pad * 4   # resident wcat (x2 bufs) + stats/affine
    # Per-batch-element bytes including the x2 double-buffer factor on every
    # streamed block plus f32 intermediates (z, y).
    per_b_a = (2 * n * n * w_itm
               + 2 * n * c_pad * itm
               + 2 * n * c_pad * spill_itm
               + 4 * n * c_pad * 4)
    per_b_b = (2 * n * c_pad * spill_itm
               + 2 * n * c_pad * itm
               + 2 * n * c_pad * 4)
    if tile_b is None:
        tile_b = _largest_divisor_tile(bs, per_b_a, max(budget - fixed, per_b_a))
    if tile_b_norm is None:
        tile_b_norm = _largest_divisor_tile(bs, per_b_b, max(budget - fixed, per_b_b))
    assert bs % tile_b == 0 and bs % tile_b_norm == 0
    nt_a = bs // tile_b
    nt_b = bs // tile_b_norm
    inv_count = 1.0 / float(bs * n)

    # ---------------- kernel A: fused matmuls + y spill + per-channel stats ---
    def stats_kernel(w_ref, x_ref, wcat_ref, y_ref, sum_ref, sq_ref):
        t = pl.program_id(0)
        x2 = x_ref[...].reshape(tile_b * n, c_pad)
        # One 2*c_pad-wide 1x1-conv matmul with a large M = tile_b*n.
        z = jnp.dot(x2, wcat_ref[...], preferred_element_type=jnp.float32)
        # Linearity: (W@x)@Wn^T == W@(x@Wn^T) -> bmm runs on the right half.
        z_r = z[:, c_pad:].reshape(tile_b, n, c_pad).astype(mm_dtype)
        y_nbr = jnp.einsum('bij,bjd->bid', w_ref[...].astype(mm_dtype), z_r,
                           preferred_element_type=jnp.float32)
        y2 = z[:, :c_pad] + y_nbr.reshape(tile_b * n, c_pad)   # (tile_b*n, c_pad) f32
        y_ref[...] = y2.reshape(tile_b, n, c_pad).astype(y_ref.dtype)

        @pl.when(t == 0)
        def _init():
            sum_ref[...] = jnp.zeros_like(sum_ref)
            sq_ref[...] = jnp.zeros_like(sq_ref)

        sum_ref[...] += jnp.sum(y2, axis=0, keepdims=True)
        sq_ref[...] += jnp.sum(y2 * y2, axis=0, keepdims=True)

    flops_a = 2 * bs * n * c_pad * (2 * c_pad) + 2 * bs * n * n * c_pad
    bytes_a = int(W.nbytes + x_p.nbytes + wcat.nbytes
                  + bs * n * c_pad * spill_itm + 2 * c_pad * 4)

    y_spill, bn_sum, bn_sq = pl.pallas_call(
        stats_kernel,
        out_shape=(jax.ShapeDtypeStruct((bs, n, c_pad), spill_dtype),
                   jax.ShapeDtypeStruct((1, c_pad), jnp.float32),
                   jax.ShapeDtypeStruct((1, c_pad), jnp.float32)),
        grid_spec=pltpu.PrefetchScalarGridSpec(
            num_scalar_prefetch=0,
            grid=(nt_a,),
            in_specs=[
                pl.BlockSpec((tile_b, n, n), lambda t: (t, 0, 0)),        # W
                pl.BlockSpec((tile_b, n, c_pad), lambda t: (t, 0, 0)),    # x
                pl.BlockSpec((c_pad, 2 * c_pad), lambda t: (0, 0)),       # wcat
            ],
            out_specs=[
                pl.BlockSpec((tile_b, n, c_pad), lambda t: (t, 0, 0)),    # y spill
                pl.BlockSpec((1, c_pad), lambda t: (0, 0)),               # sum (pinned)
                pl.BlockSpec((1, c_pad), lambda t: (0, 0)),               # sumsq (pinned)
            ],
        ),
        compiler_params=pltpu.CompilerParams(
            dimension_semantics=("arbitrary",),        # global BN stats reduction
            vmem_limit_bytes=vmem_limit,
        ),
        cost_estimate=pl.CostEstimate(flops=int(flops_a), transcendentals=0,
                                      bytes_accessed=bytes_a),
    )(W, x_p, wcat)

    # ---------------- kernel B: fold BN affine, normalize + ReLU --------------
    def norm_kernel(y_ref, sum_ref, sq_ref, g_ref, b_ref, o_ref):
        mean = sum_ref[...] * inv_count                                    # (1, c_pad)
        var = jnp.maximum(sq_ref[...] * inv_count - mean * mean, 0.0)      # clamp >= 0
        scale = g_ref[...] * lax.rsqrt(var + BN_EPS)
        shift = b_ref[...] - mean * scale
        y2 = y_ref[...].reshape(tile_b_norm * n, c_pad).astype(jnp.float32)
        o_ref[...] = jnp.maximum(y2 * scale + shift, 0.0).reshape(
            tile_b_norm, n, c_pad).astype(o_ref.dtype)

    out_p = pl.pallas_call(
        norm_kernel,
        out_shape=jax.ShapeDtypeStruct((bs, n, c_pad), in_dtype),
        grid_spec=pltpu.PrefetchScalarGridSpec(
            num_scalar_prefetch=0,
            grid=(nt_b,),
            in_specs=[
                pl.BlockSpec((tile_b_norm, n, c_pad), lambda t: (t, 0, 0)),  # y
                pl.BlockSpec((1, c_pad), lambda t: (0, 0)),                  # sum
                pl.BlockSpec((1, c_pad), lambda t: (0, 0)),                  # sumsq
                pl.BlockSpec((1, c_pad), lambda t: (0, 0)),                  # gamma
                pl.BlockSpec((1, c_pad), lambda t: (0, 0)),                  # beta
            ],
            out_specs=pl.BlockSpec((tile_b_norm, n, c_pad), lambda t: (t, 0, 0)),
        ),
        compiler_params=pltpu.CompilerParams(
            dimension_semantics=("parallel",),         # v7x: shard across both TCs
            vmem_limit_bytes=vmem_limit,
        ),
        cost_estimate=pl.CostEstimate(
            flops=int(4 * bs * n * c_pad),
            transcendentals=int(nt_b * c_pad),
            bytes_accessed=int(bs * n * c_pad * (spill_itm + itm) + 4 * c_pad * 4)),
    )(y_spill, bn_sum, bn_sq, g2, b2)

    return out_p[:, :, :c] if pad else out_p


def gconv_reference(W, x, conv_w, conv_b, gamma, beta):
    """Pure-JAX reference matching the PyTorch forward (bias included)."""
    x_nbr = jnp.einsum('bij,bjc->bic', W, x)
    cat = jnp.concatenate([x, x_nbr], axis=-1)
    y = jnp.einsum('bic,oc->bio', cat, conv_w) + conv_b
    mean = jnp.mean(y, axis=(0, 1), keepdims=True)
    var = jnp.mean(jnp.square(y - mean), axis=(0, 1), keepdims=True)
    y_hat = (y - mean) / jnp.sqrt(var + BN_EPS) * gamma + beta
    return jnp.maximum(y_hat, 0.0)


if __name__ == "__main__":
    bs, n, c = 4, 8, 32   # batch=4, nodes/seq=8, in_channels=32
    key = jax.random.PRNGKey(0)
    k1, k2, k3, k4 = jax.random.split(key, 4)

    x = jax.random.normal(k1, (bs, n, c), jnp.float32)
    # Row-stochastic graph weights (typical Gconv input), deterministic.
    W = jax.nn.softmax(jax.random.normal(k2, (bs, n, n), jnp.float32), axis=-1)

    # Conv2d(2c -> c, 1x1): weight ~ N(0, sqrt(2/out_channels)) as in __init__.
    conv_w = jax.random.normal(k3, (c, 2 * c), jnp.float32) * math.sqrt(2.0 / c)
    # Conv2d default bias init: U(-1/sqrt(fan_in), 1/sqrt(fan_in)), fan_in = 2c.
    bound = 1.0 / math.sqrt(2 * c)
    conv_b = jax.random.uniform(k4, (c,), jnp.float32, -bound, bound)
    # BatchNorm2d init from __init__: gamma=1, beta=0.
    gamma = jnp.ones((c,), jnp.float32)
    beta = jnp.zeros((c,), jnp.float32)

    ref = gconv_reference(W, x, conv_w, conv_b, gamma, beta)

    # Multi-tile path: exercises cross-tile stats accumulation + parallel norm sweep.
    out_tiled = gconv(W, x, conv_w, conv_b, gamma, beta, tile_b=2, tile_b_norm=2)
    jax.block_until_ready(out_tiled)
    assert out_tiled.shape == (bs, n, c)
    assert jnp.allclose(out_tiled, ref, rtol=1e-4, atol=1e-4), "tiled mismatch"

    # Auto-picked, VMEM-filling tiles (single batch tile at these shapes).
    out_auto = gconv(W, x, conv_w, conv_b, gamma, beta)
    jax.block_until_ready(out_auto)
    assert jnp.allclose(out_auto, ref, rtol=1e-4, atol=1e-4), "auto-tile mismatch"

    # bf16 inputs: both matmuls hit the native MXU path (loose tolerance check).
    xb = x.astype(jnp.bfloat16)
    Wb = W.astype(jnp.bfloat16)
    cwb = conv_w.astype(jnp.bfloat16)
    ref_b = gconv_reference(Wb.astype(jnp.float32), xb.astype(jnp.float32),
                            cwb.astype(jnp.float32), conv_b, gamma, beta)
    out_b = gconv(Wb, xb, cwb, conv_b, gamma, beta, tile_b=2, tile_b_norm=2)
    jax.block_until_ready(out_b)
    assert out_b.dtype == jnp.bfloat16
    assert jnp.allclose(out_b.astype(jnp.float32), ref_b, rtol=1e-1, atol=1e-1), \
        "bf16 mismatch"

    print("KERNEL_OK")
</pallas_src>

<mosaic_0001>
module attributes {stable_mosaic.version = 11 : i64} {
  func.func @stats_kernel(%arg0: i32, %arg1: memref<2x8x8xf32, #tpu.memory_space<vmem>>, %arg2: memref<2x8x128xf32, #tpu.memory_space<vmem>>, %arg3: memref<128x256xf32, #tpu.memory_space<vmem>>, %arg4: memref<2x8x128xf32, #tpu.memory_space<vmem>>, %arg5: memref<1x128xf32, #tpu.memory_space<vmem>>, %arg6: memref<1x128xf32, #tpu.memory_space<vmem>>) attributes {dimension_semantics = [#tpu.dimension_semantics<arbitrary>], iteration_bounds = array<i64: 2>, scalar_prefetch = 0 : i64, scratch_operands = 0 : i64, tpu.core_type = #tpu.core_type<tc>, window_params = [{transform_indices = @transform_0, window_bounds = array<i64: 2, 8, 8>}, {transform_indices = @transform_1, window_bounds = array<i64: 2, 8, 128>}, {pipeline_mode = #tpu.pipeline_mode<synchronous>, transform_indices = @transform_2, window_bounds = array<i64: 128, 256>}, {transform_indices = @transform_3, window_bounds = array<i64: 2, 8, 128>}, {pipeline_mode = #tpu.pipeline_mode<synchronous>, transform_indices = @transform_4, window_bounds = array<i64: 1, 128>}, {pipeline_mode = #tpu.pipeline_mode<synchronous>, transform_indices = @transform_5, window_bounds = array<i64: 1, 128>}]} {
    %c0 = arith.constant 0 : index
    %c0_0 = arith.constant 0 : index
    %c0_1 = arith.constant 0 : index
    %0 = vector.load %arg2[%c0, %c0_0, %c0_1] : memref<2x8x128xf32, #tpu.memory_space<vmem>>, vector<2x8x128xf32>
    %1 = vector.shape_cast %0 : vector<2x8x128xf32> to vector<16x128xf32>
    %c0_2 = arith.constant 0 : index
    %c0_3 = arith.constant 0 : index
    %2 = vector.load %arg3[%c0_2, %c0_3] : memref<128x256xf32, #tpu.memory_space<vmem>>, vector<128x256xf32>
    %cst = arith.constant dense<0.000000e+00> : vector<16x256xf32>
    %3 = tpu.matmul %1, %2, %cst {dimension_numbers = #tpu.dot_dimension_numbers<[1], [0], [0], [1], [0, 0, 1, 1], [], []>} : vector<16x128xf32>, vector<128x256xf32>, vector<16x256xf32> -> vector<16x256xf32>
    %4 = vector.extract_strided_slice %3 {offsets = [0, 128], sizes = [16, 128], strides = [1, 1]} : vector<16x256xf32> to vector<16x128xf32>
    %5 = vector.shape_cast %4 : vector<16x128xf32> to vector<2x8x128xf32>
    %c0_4 = arith.constant 0 : index
    %c0_5 = arith.constant 0 : index
    %c0_6 = arith.constant 0 : index
    %6 = vector.load %arg1[%c0_4, %c0_5, %c0_6] : memref<2x8x8xf32, #tpu.memory_space<vmem>>, vector<2x8x8xf32>
    "tpu.trace_start"() <{level = 10 : i32, message = "bij,bjd->bid"}> : () -> ()
    %cst_7 = arith.constant dense<0.000000e+00> : vector<2x8x128xf32>
    %7 = tpu.matmul %6, %5, %cst_7 {dimension_numbers = #tpu.dot_dimension_numbers<[2], [1], [1], [2], [0, 0, 0, 1, 1, 2], [0], [0]>} : vector<2x8x8xf32>, vector<2x8x128xf32>, vector<2x8x128xf32> -> vector<2x8x128xf32>
    "tpu.trace_stop"() : () -> ()
    %8 = vector.extract_strided_slice %3 {offsets = [0, 0], sizes = [16, 128], strides = [1, 1]} : vector<16x256xf32> to vector<16x128xf32>
    %9 = vector.shape_cast %7 : vector<2x8x128xf32> to vector<16x128xf32>
    %10 = arith.addf %8, %9 : vector<16x128xf32>
    %11 = vector.shape_cast %10 : vector<16x128xf32> to vector<2x8x128xf32>
    %c0_8 = arith.constant 0 : index
    %c0_9 = arith.constant 0 : index
    %c0_10 = arith.constant 0 : index
    %12 = vector.load %arg4[%c0_8, %c0_9, %c0_10] : memref<2x8x128xf32, #tpu.memory_space<vmem>>, vector<2x8x128xf32>
    tpu.vector_store %arg4[%c0_8, %c0_9, %c0_10], %11 {strides = array<i32>} : memref<2x8x128xf32, #tpu.memory_space<vmem>>, vector<2x8x128xf32>,
    %c0_i32 = arith.constant 0 : i32
    %13 = arith.cmpi eq, %arg0, %c0_i32 : i32
    %14 = arith.extui %13 : i1 to i32
    %c0_i32_11 = arith.constant 0 : i32
    %15 = arith.cmpi ne, %14, %c0_i32_11 : i32
    scf.if %15 {
      %cst_22 = arith.constant 0.000000e+00 : f32
      %27 = vector.broadcast %cst_22 : f32 to vector<1x128xf32>
      %c0_23 = arith.constant 0 : index
      %c0_24 = arith.constant 0 : index
      %28 = vector.load %arg5[%c0_23, %c0_24] : memref<1x128xf32, #tpu.memory_space<vmem>>, vector<1x128xf32>
      tpu.vector_store %arg5[%c0_23, %c0_24], %27 {strides = array<i32>} : memref<1x128xf32, #tpu.memory_space<vmem>>, vector<1x128xf32>,
      %cst_25 = arith.constant 0.000000e+00 : f32
      %29 = vector.broadcast %cst_25 : f32 to vector<1x128xf32>
      %c0_26 = arith.constant 0 : index
      %c0_27 = arith.constant 0 : index
      %30 = vector.load %arg6[%c0_26, %c0_27] : memref<1x128xf32, #tpu.memory_space<vmem>>, vector<1x128xf32>
      tpu.vector_store %arg6[%c0_26, %c0_27], %29 {strides = array<i32>} : memref<1x128xf32, #tpu.memory_space<vmem>>, vector<1x128xf32>,
    } else {
    }
    %c0_12 = arith.constant 0 : index
    %c0_13 = arith.constant 0 : index
    %16 = vector.load %arg5[%c0_12, %c0_13] : memref<1x128xf32, #tpu.memory_space<vmem>>, vector<1x128xf32>
    %cst_14 = arith.constant dense<0.000000e+00> : vector<128xf32>
    %17 = vector.multi_reduction <add>, %10, %cst_14 [0] : vector<16x128xf32> to vector<128xf32>
    %18 = vector.shape_cast %17 : vector<128xf32> to vector<1x128xf32>
    %19 = arith.addf %16, %18 : vector<1x128xf32>
    %c0_15 = arith.constant 0 : index
    %c0_16 = arith.constant 0 : index
    %20 = vector.load %arg5[%c0_15, %c0_16] : memref<1x128xf32, #tpu.memory_space<vmem>>, vector<1x128xf32>
    tpu.vector_store %arg5[%c0_15, %c0_16], %19 {strides = array<i32>} : memref<1x128xf32, #tpu.memory_space<vmem>>, vector<1x128xf32>,
    %c0_17 = arith.constant 0 : index
    %c0_18 = arith.constant 0 : index
    %21 = vector.load %arg6[%c0_17, %c0_18] : memref<1x128xf32, #tpu.memory_space<vmem>>, vector<1x128xf32>
    %22 = arith.mulf %10, %10 : vector<16x128xf32>
    %cst_19 = arith.constant dense<0.000000e+00> : vector<128xf32>
    %23 = vector.multi_reduction <add>, %22, %cst_19 [0] : vector<16x128xf32> to vector<128xf32>
    %24 = vector.shape_cast %23 : vector<128xf32> to vector<1x128xf32>
    %25 = arith.addf %21, %24 : vector<1x128xf32>
    %c0_20 = arith.constant 0 : index
    %c0_21 = arith.constant 0 : index
    %26 = vector.load %arg6[%c0_20, %c0_21] : memref<1x128xf32, #tpu.memory_space<vmem>>, vector<1x128xf32>
    tpu.vector_store %arg6[%c0_20, %c0_21], %25 {strides = array<i32>} : memref<1x128xf32, #tpu.memory_space<vmem>>, vector<1x128xf32>,
    return
  }
  func.func @transform_0(%arg0: i32) -> (i32, i32, i32) {
    %c0_i32 = arith.constant 0 : i32
    %c0_i32_0 = arith.constant 0 : i32
    %c0_i32_1 = arith.constant 0 : i32
    return %arg0, %c0_i32, %c0_i32_0 : i32, i32, i32
  }
  func.func @transform_1(%arg0: i32) -> (i32, i32, i32) {
    %c0_i32 = arith.constant 0 : i32
    %c0_i32_0 = arith.constant 0 : i32
    %c0_i32_1 = arith.constant 0 : i32
    return %arg0, %c0_i32, %c0_i32_0 : i32, i32, i32
  }
  func.func @transform_2(%arg0: i32) -> (i32, i32) {
    %c0_i32 = arith.constant 0 : i32
    %c0_i32_0 = arith.constant 0 : i32
    %c0_i32_1 = arith.constant 0 : i32
    return %c0_i32, %c0_i32_0 : i32, i32
  }
  func.func @transform_3(%arg0: i32) -> (i32, i32, i32) {
    %c0_i32 = arith.constant 0 : i32
    %c0_i32_0 = arith.constant 0 : i32
    %c0_i32_1 = arith.constant 0 : i32
    return %arg0, %c0_i32, %c0_i32_0 : i32, i32, i32
  }
  func.func @transform_4(%arg0: i32) -> (i32, i32) {
    %c0_i32 = arith.constant 0 : i32
    %c0_i32_0 = arith.constant 0 : i32
    %c0_i32_1 = arith.constant 0 : i32
    return %c0_i32, %c0_i32_0 : i32, i32
  }
  func.func @transform_5(%arg0: i32) -> (i32, i32) {
    %c0_i32 = arith.constant 0 : i32
    %c0_i32_0 = arith.constant 0 : i32
    %c0_i32_1 = arith.constant 0 : i32
    return %c0_i32, %c0_i32_0 : i32, i32
  }
}

</mosaic_0001>

<bundles_post_ra>
// kernel: tpu_custom_call.1
= control target key start
LH: loop header
LB: loop body
LE: loop exit
PB: predicated region body
PF: predicated region fallthrough
CT: control target
= control target key end

     0   :  { %s1207_s0 = inlined_call_operand.hbm [shape: f32[4,8,8], index: 0, kind: input, shape index: {}]   ;;  %s1208_s1 = inlined_call_operand.hbm [shape: f32[4,8,128], index: 1, kind: input, shape index: {}]   ;;  %s1209_s2 = inlined_call_operand.hbm [shape: f32[128,256], index: 2, kind: input, shape index: {}]   ;;  %s1210_s3 = inlined_call_operand.hbm [shape: f32[4,8,128], index: 3, kind: output, shape index: {0}]   ;;  %s1211_s4 = inlined_call_operand.hbm [shape: f32[1,128], index: 4, kind: output, shape index: {1}]   ;;  %s1212_s5 = inlined_call_operand.hbm [shape: f32[1,128], index: 5, kind: output, shape index: {2}]  }
   0x1   :  { %1215 = sst [smem:[#allocation19_spill]] %s1207_s0 }
   0x2   :  { %1216 = sst [smem:[#allocation20_spill]] %s1209_s2 }
   0x3   :  { %11 = vsyncpa [#allocation3], 0 }
   0x4   :  { %13 = vsyncpa [#allocation3 + $0x1], 0 }
   0x5   :  { %14 = vsyncpa [#allocation6], 0 }
   0x6   :  { %16 = vsyncpa [#allocation6 + $0x1], 0 }
   0x7   :  { %17 = vsyncpa [#allocation4], 0 }
   0x8   :  { %19 = vsyncpa [#allocation4 + $0x1], 0 }
   0x9   :  { %20 = vsyncpa [#allocation10], 0  ;;  %s1010_s18 = smov 0   ;;  %s1012_s19 = smov 0  }
   0xa   :  { %s1014_s20 = smov 0   ;;  %s1016_s21 = smov 0  }
   0xb LB: > { %1217 = sst [smem:[#allocation17_spill]] %s964_s20  ;;  %s1031_s22 = sadd.s32 4294967295, %s968_s21   ;;  %s968_s21 = sphi %s1016_s21, %s1236_s21   ;;  %s964_s20 = sphi %s1014_s20, %s1233_s20   ;;  %s960_s19 = sphi %s1012_s19, %s1235_s19   ;;  %s956_s18 = sphi %s1010_s18, %s1234_s18  }
   0xc   : > { %s631_s23 = sadd.s32 4294967294, %s968_s21   ;;  %p46_p0 = scmp.ne.s32.totalorder %s960_s19, %s956_s18 }
   0xd   : > { %p47_p1 = scmp.eq.s32.totalorder %s1031_s22, 0  ;;  %p1213_p2 = scmp.eq.s32.totalorder %s1031_s22, 1 }
   0xe   : > { %p123_p3 = scmp.eq.s32.totalorder %s631_s23, 1  ;;  %p632_p5 = scmp.ge.s32.totalorder %s968_s21, 1 }
   0xf   : > { %p1040_p4 = por %p47_p1, %p46_p0  ;;  %p172_p7 = scmp.lt.s32.totalorder %s968_s21, 3 }
  0x10   : > { %p1045_p6 = por %p123_p3, %p46_p0  ;;  %s1220_s2 = sld [smem:[#allocation20_spill]] }
  0x11   : > { %p1054_p9 = pnand %p632_p5, %p172_p7  ;;  %s970_s30 = smov [#allocation7]  }
  0x12   : > { %s185_s6 = sshll.u32 %s970_s30, 4  ;;  %s1064_s7 = sadd.s32 1, %s968_s21   ;;  %s186_s6 = int_to_ptr.vmem [resolvable:$true] %s185_s6 }
  0x13   : > { %p679_p10 = pneg %p1054_p9  ;;  %s971_s8 = smov 256  }
  0x14   : > { %s972_s9 = smov 16   ;;  %s30_s10 = ssub.s32 %s968_s21, %s1064_s7 }
  0x15   : > { %p680_p11 = pnand %p679_p10, %p47_p1  ;;  %s33_s11 = sadd.s32 1, %s964_s20 }
  0x16   : > { %s183_s28 = sshll.u32 %s1220_s2, 4  ;;  %p31_p13 = scmp.eq.s32.totalorder %s30_s10, 0  ;;  %s184_s28 = int_to_ptr.hbm [resolvable:$true] %s183_s28 }
  0x17   : > { %682 = dma.hbm_to_vmem [thread:$0]  (!%p680_p11), %s184_s28, 4096, %s186_s6, [#allocation6], %s971_s8, %s971_s8, %s972_s9  }
  0x18   : > { %p40_p0 = scmp.ne.s32.totalorder %s964_s20, %s960_s19  ;;  %p41_p3 = scmp.eq.s32.totalorder %s968_s21, 0 }
  0x19   : > { %p695_p5 = scmp.lt.s32.totalorder %s968_s21, 2  ;;  %s199_s14 = sand.u32 1, %s964_s20  }
  0x1a   : > { %s1074_s12 = scalar_select %p31_p13, %s964_s20, %s33_s11  }
  0x1b   : > { %p42_p7 = por %p41_p3, %p40_p0  ;;  %p1078_p10 = por %p1213_p2, %p40_p0 }
  0x1c   : > { %1222 = sst [smem:[#allocation18_spill]] %s1074_s12  ;;  %s658_s15 = sshll.u32 %s968_s21, 4 }
  0x1d   : > { %s1084_s16 = sshll.u32 %s199_s14, 4  ;;  %s1224_s0 = sld [smem:[#allocation19_spill]] }
  0x1e   : > { %s203_s28 = scalar_lea.vmem [#allocation2], %s1084_s16  ;;  %p1092_p11 = pnand %p695_p5, %p42_p7 }
  0x1f   : > { %s211_s30 = sshll.u32 %s203_s28, 4  ;;  %s230_s10 = scalar_lea.hbm %s1208_s1, %s658_s15  ;;  %s212_s30 = int_to_ptr.vmem [resolvable:$true] %s211_s30 }
  0x20   : > { %s200_s11 = scalar_lea.sflag [#allocation3], %s199_s14  ;;  %p778_p0 = pneg %p1092_p11 }
  0x23   : > { %s208_s26 = scalar_lea.hbm %s1224_s0, %s658_s15  ;;  %s781_s2 = scalar_lea.hbm %s1224_s0, 32 }
  0x24   : > { %s209_s27 = sshll.u32 %s208_s26, 4  ;;  %s210_s27 = int_to_ptr.hbm [resolvable:$true] %s209_s27 }
  0x25   : > { %s774_s17 = sshra.s32 %s210_s27, 4  ;;  %s775_s17 = int_to_ptr.hbm [resolvable:$true] %s774_s17 }
  0x26   : > { %s776_s23 = scalar_lea.hbm %s775_s17, 16  ;;  %p782_p7 = scmp.lt.s32.totalorder %s775_s17, %s1224_s0 }
  0x27   : > { %p777_p13 = scmp.ne.s32.totalorder %s775_s17, %s776_s23  ;;  %p783_p12 = scmp.lt.s32.totalorder %s781_s2, %s776_s23 }
  0x29   : > { %p779_p3 = pnand %p778_p0, %p777_p13  ;;  %p784_p2 = por %p783_p12, %p782_p7 }
  0x2b   : > { %p780_p5 = pneg %p779_p3 }
  0x2d   : > { %p785_p8 = pnand %p784_p2, %p780_p5 }
  0x2f   : > { %788 = shalt.err (!%p785_p8)
}
  0x30   : > { %s973_s14 = smov 128   ;;  %s974_s15 = smov 8  }
  0x31   : > { %686 = dma.hbm_to_vmem [thread:$0]  (!%p1092_p11), %s210_s27, 256, %s212_s30, %s200_s11, %s973_s14, %s973_s14, %s974_s15  }
  0x32   : > { %s231_s9 = sshll.u32 %s230_s10, 4  ;;  %s225_s20 = scalar_lea.vmem [#allocation5], %s1084_s16  ;;  %s232_s9 = int_to_ptr.hbm [resolvable:$true] %s231_s9 }
  0x33   : > { %s233_s26 = sshll.u32 %s225_s20, 4  ;;  %s221_s28 = sand.u32 1, %s968_s21   ;;  %s234_s26 = int_to_ptr.vmem [resolvable:$true] %s233_s26 }
  0x34   : > { %s222_s12 = scalar_lea.sflag [#allocation6], %s221_s28  ;;  %s804_s17 = sshra.s32 %s232_s9, 4  ;;  %s805_s17 = int_to_ptr.hbm [resolvable:$true] %s804_s17 }
  0x35   : > { %s806_s2 = scalar_lea.hbm %s805_s17, 16  ;;  %s811_s0 = scalar_lea.hbm %s1208_s1, 32 }
  0x36   : > { %p807_p2 = scmp.ne.s32.totalorder %s805_s17, %s806_s2  ;;  %p812_p13 = scmp.lt.s32.totalorder %s805_s17, %s1208_s1 }
  0x37   : > { %p813_p3 = scmp.lt.s32.totalorder %s811_s0, %s806_s2 }
  0x38   : > { %p809_p8 = pnand %p807_p2, %p778_p0 }
  0x39   : > { %p814_p5 = por %p813_p3, %p812_p13 }
  0x3a   : > { %p810_p12 = pneg %p809_p8 }
  0x3c   : > { %p815_p7 = pnand %p814_p5, %p810_p12 }
  0x3e   : > { %818 = shalt.err (!%p815_p7)
}
  0x3f   : > { %689 = dma.hbm_to_vmem [thread:$0]  (!%p1092_p11), %s232_s9, 256, %s234_s26, %s222_s12, %s973_s14, %s973_s14, %s974_s15  }
  0x40   : > { %245 = sbr.rel (%p1054_p9) target bundleno = 408 (0x198), region = 32  ;;  %s1128_s20 = sand.u32 (!%p1054_p9), 1, %s960_s19  }
  0x41   : > { %s1131_s16 = sshll.u32 (!%p1054_p9), %s1128_s20, 4  ;;  %s248_s10 = scalar_lea.sflag (!%p1054_p9), [#allocation3], %s1128_s20 }
  0x42   : > { %s251_s0 = scalar_lea.vmem (!%p1054_p9), [#allocation2], %s1131_s16 }
  0x45   : > { %935 = dma.done.wait (%p1040_p4), %s248_s10, 256  }
  0x46   : > { %937 = vsyncadd (%p1040_p4), %s248_s10, 4294967040  ;;  %s257_s29 = sand.u32 1, %s1031_s22   ;;  %s261_s11 = scalar_lea.vmem [#allocation5], %s1131_s16 }
  0x47   : > { %s258_s6 = scalar_lea.sflag [#allocation6], %s257_s29 }
  0x48   : > { %939 = dma.done.wait (%p1040_p4), %s258_s6, 256  }
  0x49   : > { %941 = vsyncadd (%p1040_p4), %s258_s6, 4294967040 }
  0x4a   : > { %943 = dma.done.wait (%p47_p1), [#allocation6], 4096  }
  0x4b   : > { %945 = vsyncadd (%p47_p1), [#allocation6], 4294963200  ;;  %v335_v0 = vld [vmem:[#allocation7 + $0xf8] sm:$0xff]  ;;  %v333_v1 = vld [vmem:[#allocation7 + $0xe8] sm:$0xff]  ;;  %vm384_vm0 = vcmask 64512   ;;  %s294_s24 = scalar_lea.vmem [#allocation8], %s1131_s16 }
  0x4c   : > { %359 = vmatpush.msra.mxu1 %v335_v0  ;;  %v331_v2 = vld [vmem:[#allocation7 + $0xd8] sm:$0xff]  ;;  %v329_v3 = vld [vmem:[#allocation7 + $0xc8] sm:$0xff]  ;;  %v334_v6 = vld [vmem:[#allocation7 + $0xf0] sm:$0xff]  ;;  %p1226_p1 = scmp.ne.s32.totalorder %s1031_s22, 0 }
  0x4d   : > { %v327_v4 = vld [vmem:[#allocation7 + $0xb8] sm:$0xff]  ;;  %v325_v5 = vld [vmem:[#allocation7 + $0xa8] sm:$0xff]  ;;  %v332_v7 = vld [vmem:[#allocation7 + $0xe0] sm:$0xff]  ;;  %336 = vmatpush.msra.mxu0 %v334_v6 }
  0x4e   : > { %360 = vmatpush.msra.mxu1 %v333_v1  ;;  %v323_v8 = vld [vmem:[#allocation7 + $0x98] sm:$0xff]  ;;  %v330_v9 = vld [vmem:[#allocation7 + $0xd0] sm:$0xff]  ;;  %v321_v10 = vld [vmem:[#allocation7 + $0x88] sm:$0xff] }
  0x4f   : > { %337 = vmatpush.msra.mxu0 %v332_v7  ;;  %v328_v11 = vld [vmem:[#allocation7 + $0xc0] sm:$0xff]  ;;  %v319_v12 = vld [vmem:[#allocation7 + $0x78] sm:$0xff]  ;;  %v326_v13 = vld [vmem:[#allocation7 + $0xb0] sm:$0xff] }
  0x50   : > { %361 = vmatpush.msra.mxu1 %v331_v2  ;;  %v317_v14 = vld [vmem:[#allocation7 + $0x68] sm:$0xff]  ;;  %v324_v15 = vld [vmem:[#allocation7 + $0xa0] sm:$0xff]  ;;  %v315_v16 = vld [vmem:[#allocation7 + $0x58] sm:$0xff] }
  0x51   : > { %338 = vmatpush.msra.mxu0 %v330_v9  ;;  %v322_v17 = vld [vmem:[#allocation7 + $0x90] sm:$0xff]  ;;  %v313_v18 = vld [vmem:[#allocation7 + $0x48] sm:$0xff]  ;;  %v320_v19 = vld [vmem:[#allocation7 + $0x80] sm:$0xff] }
  0x52   : > { %362 = vmatpush.msra.mxu1 %v329_v3  ;;  %v311_v20 = vld [vmem:[#allocation7 + $0x38] sm:$0xff]  ;;  %v318_v21 = vld [vmem:[#allocation7 + $0x70] sm:$0xff]  ;;  %v309_v22 = vld [vmem:[#allocation7 + $0x28] sm:$0xff] }
  0x53   : > { %339 = vmatpush.msra.mxu0 %v328_v11  ;;  %v316_v23 = vld [vmem:[#allocation7 + $0x60] sm:$0xff]  ;;  %v307_v24 = vld [vmem:[#allocation7 + $0x18] sm:$0xff]  ;;  %v314_v25 = vld [vmem:[#allocation7 + $0x50] sm:$0xff] }
  0x54   : > { %363 = vmatpush.msra.mxu1 %v327_v4  ;;  %v305_v26 = vld [vmem:[#allocation7 + $0x8] sm:$0xff]  ;;  %v312_v27 = vld [vmem:[#allocation7 + $0x40] sm:$0xff]  ;;  %v310_v30 = vld [vmem:[#allocation7 + $0x30] sm:$0xff] }
  0x55   : > { %340 = vmatpush.msra.mxu0 %v326_v13  ;;  %v302_v28 = vld [vmem:[%s261_s11] sm:$0xff]  ;;  %v303_v29 = vld [vmem:[%s261_s11 + $0x8] sm:$0xff] }
  0x56   : > { %364 = vmatpush.msra.mxu1 %v325_v5  ;;  %v308_v31 = vld [vmem:[#allocation7 + $0x20] sm:$0xff]  ;;  %v306_v32 = vld [vmem:[#allocation7 + $0x10] sm:$0xff]  ;;  %v383_v36 = vld [vmem:[%s251_s0 + $0x8] sm:$0xff] }
  0x57   : > { %341 = vmatpush.msra.mxu0 %v324_v15  ;;  %v304_v33 = vld [vmem:[#allocation7] sm:$0xff] }
  0x58   : > { %365 = vmatpush.msra.mxu1 %v323_v8  ;;  %v382_v34 = vld [vmem:[%s251_s0] sm:$0xff] }
  0x59   : > { %342 = vmatpush.msra.mxu0 %v322_v17 }
  0x5a   : > { %366 = vmatpush.msra.mxu1 %v321_v10 }
  0x5b   : > { %343 = vmatpush.msra.mxu0 %v320_v19 }
  0x5c   : > { %367 = vmatpush.msra.mxu1 %v319_v12 }
  0x5d   : > { %344 = vmatpush.msra.mxu0 %v318_v21 }
  0x5e   : > { %368 = vmatpush.msra.mxu1 %v317_v14 }
  0x5f   : > { %345 = vmatpush.msra.mxu0 %v316_v23 }
  0x60   : > { %369 = vmatpush.msra.mxu1 %v315_v16 }
  0x61   : > { %346 = vmatpush.msra.mxu0 %v314_v25 }
  0x62   : > { %370 = vmatpush.msra.mxu1 %v313_v18 }
  0x63   : > { %347 = vmatpush.msra.mxu0 %v312_v27 }
  0x64   : > { %371 = vmatpush.msra.mxu1 %v311_v20 }
  0x65   : > { %348 = vmatpush.msra.mxu0 %v310_v30 }
  0x66   : > { %372 = vmatpush.msra.mxu1 %v309_v22 }
  0x67   : > { %349 = vmatpush.msra.mxu0 %v308_v31 }
  0x68   : > { %373 = vmatpush.msra.mxu1 %v307_v24 }
  0x69   : > { %350 = vmatpush.msra.mxu0 %v306_v32 }
  0x6a   : > { %374 = vmatpush.msra.mxu1 %v305_v26 }
  0x6b   : > { %375 = vmatmul.f32.vlgmr.msra.gmra.mxu1 %v302_v28  ;;  %351 = vmatpush.msra.mxu0 %v304_v33 }
  0x6c   : > { %352 = vmatmul.f32.vlgmr.msra.gmra.mxu0 %v302_v28 }
  0x73   : > { %378 = vmatmul.f32.gmra.mxu1 %v303_v29 }
  0x74   : > { %355 = vmatmul.f32.gmra.mxu0 %v303_v29 }
  0xe8   : > { %v376_v35 = vpop.f32.mrf.mxu1 }
  0xe9   : > { %403 = vmatpush.msra.mxu2 %v376_v35  ;;  %v353_v38 = vpop.f32.mrf.mxu0 }
  0xea   : > { %646 = vmatmul.msk.f32.vlgmr.msra.gmra.mxu2 %vm384_vm0, %v382_v34 }
  0xf0   : > { %v379_v37 = vpop.f32.mrf.mxu1 }
  0xf1   : > { %426 = vmatpush.msra.mxu3 %v379_v37  ;;  %v356_v41 = vpop.f32.mrf.mxu0 }
  0xf2   : > { %647 = vmatmul.msk.f32.vlgmr.msra.gmra.mxu3 %vm384_vm0, %v383_v36 }
 0x16d   : > { %v405_v39 = vpop.f32.mrf.mxu2 }
 0x16e   : > { %v431_v40 = vadd.f32 %v405_v39, %v353_v38 }
 0x170   : > { %433 = vst [vmem:[%s294_s24] sm:$0xff] %v431_v40 }
 0x174   : > { %438 = sbr.rel (%p1226_p1) target bundleno = 380 (0x17c), region = 48 }
 0x175   : > { %v428_v42 = vpop.f32.mrf.mxu3 }
 0x176   : > { %v432_v43 = vadd.f32 %v428_v42, %v356_v41 }
 0x178   : > { %434 = vst [vmem:[%s294_s24 + $0x8] sm:$0xff] %v432_v43 }
 0x179   : > { %v975_v44 = vmov 0.0  }
 0x17a   : > { %439 = vst [vmem:[#allocation9] sm:$0x1] %v975_v44 }
 0x17b   : > { %440 = vst [vmem:[#allocation11] sm:$0x1] %v975_v44 }
 0x17c PF: > { %v442_v45 = vadd.f32 %v432_v43, %v431_v40  ;;  %v452_v46 = vmul.f32 %v431_v40, %v431_v40  ;;  %v453_v47 = vmul.f32 %v432_v43, %v432_v43  ;;  %s660_s14 = sshll.u32 %s1031_s22, 4  ;;  %s476_s28 = sshll.u32 %s294_s24, 4  ;;  %s477_s28 = int_to_ptr.vmem [resolvable:$true] %s476_s28 }
 0x17d   : > { %s475_s26 = scalar_lea.hbm %s1210_s3, %s660_s14  ;;  %s464_s17 = scalar_lea.sflag [#allocation4], %s1128_s20 }
 0x17e   : > { %v443_v48 = vrot.slane %v442_v45, 4  ;;  %v454_v49 = vadd.f32 %v453_v47, %v452_v46  ;;  %s478_s12 = sshll.u32 %s475_s26, 4  ;;  %s854_s30 = scalar_lea.hbm %s1210_s3, 32  ;;  %s479_s12 = int_to_ptr.hbm [resolvable:$true] %s478_s12 }
 0x17f   : > { %s848_s2 = sshra.s32 %s479_s12, 4  ;;  %s849_s2 = int_to_ptr.hbm [resolvable:$true] %s848_s2 }
 0x180   : > { %v444_v50 = vadd.f32 %v443_v48, %v442_v45  ;;  %v455_v51 = vrot.slane %v454_v49, 4  ;;  %s850_s23 = scalar_lea.hbm %s849_s2, 16  ;;  %p855_p0 = scmp.lt.s32.totalorder %s849_s2, %s1210_s3 }
 0x181   : > { %p851_p4 = scmp.ne.s32.totalorder %s849_s2, %s850_s23  ;;  %p856_p2 = scmp.lt.s32.totalorder %s854_s30, %s850_s23 }
 0x182   : > { %v445_v52 = vrot.slane %v444_v50, 2  ;;  %v456_v53 = vadd.f32 %v455_v51, %v454_v49 }
 0x183   : > { %p852_p9 = pnand %p851_p4, %p1078_p10  ;;  %p857_p8 = por %p856_p2, %p855_p0 }
 0x184   : > { %v446_v54 = vadd.f32 %v445_v52, %v444_v50  ;;  %v457_v55 = vrot.slane %v456_v53, 2 }
 0x185   : > { %p853_p11 = pneg %p852_p9 }
 0x187   : > { %p858_p12 = pnand %p857_p8, %p853_p11 }
 0x189   : > { %861 = shalt.err (!%p858_p12)
}
 0x18a   : > { %s976_s20 = smov 128   ;;  %s977_s0 = smov 8   ;;  %v447_v56 = vrot.slane %v446_v54, 1  ;;  %v458_v57 = vadd.f32 %v457_v55, %v456_v53  ;;  %v441_v58 = vld [vmem:[#allocation9] sm:$0x1] }
 0x18b   : > { %669 = dma.vmem_to_hbm [thread:$0]  (%p1078_p10), %s477_s28, 256, %s479_s12, %s464_s17, %s976_s20, %s976_s20, %s977_s0   ;;  %v451_v61 = vld [vmem:[#allocation11] sm:$0x1] }
 0x18c   : > { %s978_s29 = smov [#allocation9]   ;;  %s493_s14 = sshll.u32 %s1211_s4, 4  ;;  %v448_v59 = vadd.f32 %v447_v56, %v446_v54  ;;  %v459_v60 = vrot.slane %v458_v57, 1  ;;  %s494_s14 = int_to_ptr.hbm [resolvable:$true] %s493_s14 }
 0x18d   : > { %s491_s6 = sshll.u32 %s978_s29, 4  ;;  %s979_s15 = smov [#allocation11]   ;;  %s492_s6 = int_to_ptr.vmem [resolvable:$true] %s491_s6 }
 0x18e   : > { %s503_s9 = sshll.u32 %s979_s15, 4  ;;  %s505_s28 = sshll.u32 %s1212_s5, 4  ;;  %v449_v62 = vadd.f32 %v448_v59, %v441_v58  ;;  %v460_v63 = vadd.f32 %v459_v60, %v458_v57  ;;  %s504_s9 = int_to_ptr.vmem [resolvable:$true] %s503_s9  ;;  %s506_s28 = int_to_ptr.hbm [resolvable:$true] %s505_s28 }
 0x18f   : > { %p1227_p10 = scmp.eq.s32.totalorder %s1031_s22, 1 }
 0x190   : > { %450 = vst [vmem:[#allocation9] sm:$0x1] %v449_v62  ;;  %v461_v0 = vadd.f32 %v460_v63, %v451_v61 }
 0x191   : > { %671 = dma.vmem_to_hbm [thread:$0]  (%p1227_p10), %s492_s6, 16, %s494_s14, [#allocation10]  }
 0x192   : > { %462 = vst [vmem:[#allocation11] sm:$0x1] %v461_v0  ;;  %p1228_p13 = pmov %p1227_p10  ;;  %p1229_p3 = pmov %p1227_p10 }
 0x194   : > { %673 = dma.vmem_to_hbm [thread:$0]  (%p1228_p13), %s504_s9, 16, %s506_s28, [#allocation10]  }
 0x195   : > { %947 = dma.done.wait (%p1229_p3), [#allocation10], 32   ;;  %p1230_p5 = pmov %p1229_p3 }
 0x197   : > { %949 = vsyncadd (%p1230_p5), [#allocation10], 4294967264 }
 0x198 PF: > { %s527_s12 = sand.u32 1, %s956_s18   ;;  %p1231_p7 = scmp.ge.s32.totalorder %s968_s21, 2 }
 0x199   : > { %s528_s17 = scalar_lea.sflag [#allocation4], %s527_s12 }
 0x19a   : > { %p691_p1 = pnand %p1231_p7, %p1045_p6 }
 0x19c   : > { %p692_p4 = pneg %p691_p1 }
 0x19e   : > { %951 = dma.done.wait (%p692_p4), %s528_s17, 256  }
 0x19f   : > { %953 = vsyncadd (%p692_p4), %s528_s17, 4294967040  ;;  %s1232_s2 = sld [smem:[#allocation17_spill]]  ;;  %p23_p9 = scmp.ge.s32.totalorder %s1064_s7, 4  }
 0x1a0   : > { %s1233_s20 = sld [smem:[#allocation18_spill]]  ;;  %s1234_s18 = smov %s960_s19 }
 0x1a1   : > { %s1236_s21 = smov %s1064_s7  ;;  %25 = sbr.rel (!%p23_p9) target bundleno = 11 (0xb), region = 114 }
 0x1a5   : > { %s1235_s19 = smov %s1232_s2 }
 0x1a6   :  { %534 = vsyncpa [#allocation3], 1 }
 0x1a7   :  { %536 = vsyncpa [#allocation3 + $0x1], 1 }
 0x1a8   :  { %537 = vsyncpa [#allocation6], 1 }
 0x1a9   :  { %539 = vsyncpa [#allocation6 + $0x1], 1 }
 0x1aa   :  { %540 = vsyncpa [#allocation4], 1 }
 0x1ab   :  { %542 = vsyncpa [#allocation4 + $0x1], 1 }
 0x1ac   :  { %543 = vsyncpa [#allocation10], 1 }

</bundles_post_ra>
